<compile_context>
chip_gen: v6e
topology: v6e:2x2x1
jax: 0.10.0
libtpu: 0.0.40
codegen_flags: <defaults>
</compile_context>

<pallas_src>
import functools

import jax
import jax.numpy as jnp
from jax.experimental import pallas as pl
from jax.experimental.pallas import tpu as pltpu  # noqa: F401  (TPU backend)


# ---- "QNConfig" (synthetic, deterministic) ---------------------------------
REQUEST_POOL_LEN = 4     # QNConfig.request_pool_len
INPUT_SHAPE = 16         # input feature size
ACTION_SIZE = 4          # action_size
HIDDEN0 = 32
HIDDEN1 = 64
HIDDEN2 = 32


def _dqn_kernel(x_ref,
                w0_ref, b0_ref,      # input_layer:   [F,32],  [1,32]
                w1_ref, b1_ref,      # hidden_layer1: [32,64], [1,64]
                w2_ref, b2_ref,      # hidden_layer2: [64,32], [1,32]
                hwp_ref, hbp_ref,    # packed heads:  [32,R*32], [1,R*32]
                owp_ref, obp_ref,    # block-diag:    [R*32,R*A], [1,R*A]
                out_ref):            # [B, R*A]  (lane-dense single slab)
    x = x_ref[...]
    h = jnp.maximum(
        jnp.dot(x, w0_ref[...], preferred_element_type=jnp.float32)
        + b0_ref[...], 0.0)
    h = jnp.maximum(
        jnp.dot(h, w1_ref[...], preferred_element_type=jnp.float32)
        + b1_ref[...], 0.0)
    x_share = jnp.maximum(
        jnp.dot(h, w2_ref[...], preferred_element_type=jnp.float32)
        + b2_ref[...], 0.0)

    # All R heads' hidden layers at once: [B,32] @ [32,R*32] -> [B,R*32].
    x_self = jnp.maximum(
        jnp.dot(x_share, hwp_ref[...], preferred_element_type=jnp.float32)
        + hbp_ref[...], 0.0)

    # All R output heads at once via block-diagonal weights:
    # [B,R*32] @ [R*32,R*A] -> [B,R*A]; single store.
    out_ref[...] = (
        jnp.dot(x_self, owp_ref[...], preferred_element_type=jnp.float32)
        + obp_ref[...])


def pack_params(params, *, action_size=ACTION_SIZE):
    """One-time packing of per-request head weights (hoisted out of forward)."""
    (w0, b0, w1, b1, w2, b2, hw, hb, ow, ob) = params
    R, H2, _ = hw.shape

    # Lane-pack the per-request "self" layers: (R, 32, 32) -> (32, R*32)=128.
    hw_packed = jnp.transpose(hw, (1, 0, 2)).reshape(H2, R * H2)
    hb_packed = hb.reshape(1, R * H2)

    # Block-diagonal fused output heads: (R, 32, A) -> (R*32, R*A) = (128,16).
    eye = jnp.eye(R, dtype=ow.dtype)
    ow_bd = jnp.einsum("rka,rs->rksa", ow, eye).reshape(R * H2, R * action_size)
    ob_packed = ob.reshape(1, R * action_size)

    return (w0, b0, w1, b1, w2, b2, hw_packed, hb_packed, ow_bd, ob_packed)


@functools.partial(jax.jit,
                   static_argnames=("action_size", "request_pool_len"))
def mydqn_forward(x, packed_params, *, action_size=ACTION_SIZE,
                  request_pool_len=REQUEST_POOL_LEN):
    """x: [B, F] float32.  Returns stacked head outputs [R, B, action_size]."""
    (w0, b0, w1, b1, w2, b2,
     hw_packed, hb_packed, ow_bd, ob_packed) = packed_params
    B, _ = x.shape
    R = request_pool_len

    # Single kernel invocation: no grid, whole (tiny) arrays resident in VMEM.
    out_flat = pl.pallas_call(
        _dqn_kernel,
        out_shape=jax.ShapeDtypeStruct((B, R * action_size), jnp.float32),
    )(x, w0, b0, w1, b1, w2, b2, hw_packed, hb_packed, ow_bd, ob_packed)

    # [B, R*A] (head-major columns) -> (R, B, A).
    return jnp.transpose(out_flat.reshape(B, R, action_size), (1, 0, 2))


def init_params(key, input_shape=INPUT_SHAPE, action_size=ACTION_SIZE,
                request_pool_len=REQUEST_POOL_LEN):
    """Deterministic synthetic init mirroring the module's shapes.

    Weights ~ N(0, 0.1) (as in the PyTorch module); biases ~ small uniform.
    Weights are stored [in, out]; per-request head params are stacked on axis 0.
    """
    ks = jax.random.split(key, 20)

    def w(k, shape):
        return (0.1 * jax.random.normal(k, shape)).astype(jnp.float32)

    def b(k, shape, fan_in):
        bound = 1.0 / jnp.sqrt(fan_in)
        return jax.random.uniform(
            k, shape, minval=-bound, maxval=bound).astype(jnp.float32)

    w0 = w(ks[0], (input_shape, HIDDEN0)); b0 = b(ks[1], (1, HIDDEN0), input_shape)
    w1 = w(ks[2], (HIDDEN0, HIDDEN1));     b1 = b(ks[3], (1, HIDDEN1), HIDDEN0)
    w2 = w(ks[4], (HIDDEN1, HIDDEN2));     b2 = b(ks[5], (1, HIDDEN2), HIDDEN1)

    hw = w(ks[6], (request_pool_len, HIDDEN2, HIDDEN2))
    hb = b(ks[7], (request_pool_len, 1, HIDDEN2), HIDDEN2)
    ow = w(ks[8], (request_pool_len, HIDDEN2, action_size))
    ob = b(ks[9], (request_pool_len, 1, action_size), HIDDEN2)

    return (w0, b0, w1, b1, w2, b2, hw, hb, ow, ob)


def reference_forward(x, params):
    """Pure-JAX reference of the PyTorch forward semantics."""
    (w0, b0, w1, b1, w2, b2, hw, hb, ow, ob) = params
    h = jax.nn.relu(x @ w0 + b0)
    h = jax.nn.relu(h @ w1 + b1)
    xs = jax.nn.relu(h @ w2 + b2)
    outs = []
    for r in range(hw.shape[0]):
        x_self = jax.nn.relu(xs @ hw[r] + hb[r])
        outs.append(x_self @ ow[r] + ob[r])
    return jnp.stack(outs, axis=0)


if __name__ == "__main__":
    key = jax.random.PRNGKey(0)
    kp, kx = jax.random.split(key)

    params = init_params(kp)
    packed = jax.block_until_ready(pack_params(params))

    B = 8
    x = jax.random.normal(kx, (B, INPUT_SHAPE), dtype=jnp.float32)

    out = mydqn_forward(x, packed)          # [R, B, ACTION_SIZE]
    out = jax.block_until_ready(out)

    # The PyTorch module returns a tuple of per-request tensors.
    v = tuple(out[r] for r in range(REQUEST_POOL_LEN))

    ref = reference_forward(x, params)
    assert out.shape == (REQUEST_POOL_LEN, B, ACTION_SIZE)
    assert len(v) == REQUEST_POOL_LEN
    assert jnp.allclose(out, ref, atol=1e-5, rtol=1e-5), "mismatch vs reference"

    print("KERNEL_OK")
</pallas_src>

<mosaic_0001>
module attributes {stable_mosaic.version = 11 : i64} {
  func.func @_dqn_kernel(%arg0: memref<8x16xf32, #tpu.memory_space<vmem>>, %arg1: memref<16x32xf32, #tpu.memory_space<vmem>>, %arg2: memref<1x32xf32, #tpu.memory_space<vmem>>, %arg3: memref<32x64xf32, #tpu.memory_space<vmem>>, %arg4: memref<1x64xf32, #tpu.memory_space<vmem>>, %arg5: memref<64x32xf32, #tpu.memory_space<vmem>>, %arg6: memref<1x32xf32, #tpu.memory_space<vmem>>, %arg7: memref<32x128xf32, #tpu.memory_space<vmem>>, %arg8: memref<1x128xf32, #tpu.memory_space<vmem>>, %arg9: memref<128x16xf32, #tpu.memory_space<vmem>>, %arg10: memref<1x16xf32, #tpu.memory_space<vmem>>, %arg11: memref<8x16xf32, #tpu.memory_space<vmem>>) attributes {dimension_semantics = [], scalar_prefetch = 0 : i64, scratch_operands = 0 : i64, tpu.core_type = #tpu.core_type<tc>} {
    %c0 = arith.constant 0 : index
    %c0_0 = arith.constant 0 : index
    %0 = vector.load %arg0[%c0, %c0_0] : memref<8x16xf32, #tpu.memory_space<vmem>>, vector<8x16xf32>
    %c0_1 = arith.constant 0 : index
    %c0_2 = arith.constant 0 : index
    %1 = vector.load %arg1[%c0_1, %c0_2] : memref<16x32xf32, #tpu.memory_space<vmem>>, vector<16x32xf32>
    %cst = arith.constant dense<0.000000e+00> : vector<8x32xf32>
    %2 = tpu.matmul %0, %1, %cst {dimension_numbers = #tpu.dot_dimension_numbers<[1], [0], [0], [1], [0, 0, 1, 1], [], []>} : vector<8x16xf32>, vector<16x32xf32>, vector<8x32xf32> -> vector<8x32xf32>
    %c0_3 = arith.constant 0 : index
    %c0_4 = arith.constant 0 : index
    %3 = vector.load %arg2[%c0_3, %c0_4] : memref<1x32xf32, #tpu.memory_space<vmem>>, vector<1x32xf32>
    %4 = vector.broadcast %3 : vector<1x32xf32> to vector<8x32xf32>
    %5 = arith.addf %2, %4 : vector<8x32xf32>
    %cst_5 = arith.constant 0.000000e+00 : f32
    %6 = vector.broadcast %cst_5 : f32 to vector<8x32xf32>
    %7 = arith.maximumf %5, %6 : vector<8x32xf32>
    %c0_6 = arith.constant 0 : index
    %c0_7 = arith.constant 0 : index
    %8 = vector.load %arg3[%c0_6, %c0_7] : memref<32x64xf32, #tpu.memory_space<vmem>>, vector<32x64xf32>
    %cst_8 = arith.constant dense<0.000000e+00> : vector<8x64xf32>
    %9 = tpu.matmul %7, %8, %cst_8 {dimension_numbers = #tpu.dot_dimension_numbers<[1], [0], [0], [1], [0, 0, 1, 1], [], []>} : vector<8x32xf32>, vector<32x64xf32>, vector<8x64xf32> -> vector<8x64xf32>
    %c0_9 = arith.constant 0 : index
    %c0_10 = arith.constant 0 : index
    %10 = vector.load %arg4[%c0_9, %c0_10] : memref<1x64xf32, #tpu.memory_space<vmem>>, vector<1x64xf32>
    %11 = vector.broadcast %10 : vector<1x64xf32> to vector<8x64xf32>
    %12 = arith.addf %9, %11 : vector<8x64xf32>
    %cst_11 = arith.constant 0.000000e+00 : f32
    %13 = vector.broadcast %cst_11 : f32 to vector<8x64xf32>
    %14 = arith.maximumf %12, %13 : vector<8x64xf32>
    %c0_12 = arith.constant 0 : index
    %c0_13 = arith.constant 0 : index
    %15 = vector.load %arg5[%c0_12, %c0_13] : memref<64x32xf32, #tpu.memory_space<vmem>>, vector<64x32xf32>
    %cst_14 = arith.constant dense<0.000000e+00> : vector<8x32xf32>
    %16 = tpu.matmul %14, %15, %cst_14 {dimension_numbers = #tpu.dot_dimension_numbers<[1], [0], [0], [1], [0, 0, 1, 1], [], []>} : vector<8x64xf32>, vector<64x32xf32>, vector<8x32xf32> -> vector<8x32xf32>
    %c0_15 = arith.constant 0 : index
    %c0_16 = arith.constant 0 : index
    %17 = vector.load %arg6[%c0_15, %c0_16] : memref<1x32xf32, #tpu.memory_space<vmem>>, vector<1x32xf32>
    %18 = vector.broadcast %17 : vector<1x32xf32> to vector<8x32xf32>
    %19 = arith.addf %16, %18 : vector<8x32xf32>
    %cst_17 = arith.constant 0.000000e+00 : f32
    %20 = vector.broadcast %cst_17 : f32 to vector<8x32xf32>
    %21 = arith.maximumf %19, %20 : vector<8x32xf32>
    %c0_18 = arith.constant 0 : index
    %c0_19 = arith.constant 0 : index
    %22 = vector.load %arg7[%c0_18, %c0_19] : memref<32x128xf32, #tpu.memory_space<vmem>>, vector<32x128xf32>
    %cst_20 = arith.constant dense<0.000000e+00> : vector<8x128xf32>
    %23 = tpu.matmul %21, %22, %cst_20 {dimension_numbers = #tpu.dot_dimension_numbers<[1], [0], [0], [1], [0, 0, 1, 1], [], []>} : vector<8x32xf32>, vector<32x128xf32>, vector<8x128xf32> -> vector<8x128xf32>
    %c0_21 = arith.constant 0 : index
    %c0_22 = arith.constant 0 : index
    %24 = vector.load %arg8[%c0_21, %c0_22] : memref<1x128xf32, #tpu.memory_space<vmem>>, vector<1x128xf32>
    %25 = vector.broadcast %24 : vector<1x128xf32> to vector<8x128xf32>
    %26 = arith.addf %23, %25 : vector<8x128xf32>
    %cst_23 = arith.constant 0.000000e+00 : f32
    %27 = vector.broadcast %cst_23 : f32 to vector<8x128xf32>
    %28 = arith.maximumf %26, %27 : vector<8x128xf32>
    %c0_24 = arith.constant 0 : index
    %c0_25 = arith.constant 0 : index
    %29 = vector.load %arg9[%c0_24, %c0_25] : memref<128x16xf32, #tpu.memory_space<vmem>>, vector<128x16xf32>
    %cst_26 = arith.constant dense<0.000000e+00> : vector<8x16xf32>
    %30 = tpu.matmul %28, %29, %cst_26 {dimension_numbers = #tpu.dot_dimension_numbers<[1], [0], [0], [1], [0, 0, 1, 1], [], []>} : vector<8x128xf32>, vector<128x16xf32>, vector<8x16xf32> -> vector<8x16xf32>
    %c0_27 = arith.constant 0 : index
    %c0_28 = arith.constant 0 : index
    %31 = vector.load %arg10[%c0_27, %c0_28] : memref<1x16xf32, #tpu.memory_space<vmem>>, vector<1x16xf32>
    %32 = vector.broadcast %31 : vector<1x16xf32> to vector<8x16xf32>
    %33 = arith.addf %30, %32 : vector<8x16xf32>
    %c0_29 = arith.constant 0 : index
    %c0_30 = arith.constant 0 : index
    %34 = vector.load %arg11[%c0_29, %c0_30] : memref<8x16xf32, #tpu.memory_space<vmem>>, vector<8x16xf32>
    tpu.vector_store %arg11[%c0_29, %c0_30], %33 {strides = array<i32>} : memref<8x16xf32, #tpu.memory_space<vmem>>, vector<8x16xf32>,
    return
  }
}

</mosaic_0001>

<bundles_post_ra>
// kernel: mydqn_forward.1
= control target key start
LH: loop header
LB: loop body
LE: loop exit
PB: predicated region body
PF: predicated region fallthrough
CT: control target
= control target key end

     0   :  { %v615_v0 = vmov 0.0   ;;  %vm616_vm0 = vmmov 0   ;;  %vm48_vm1 = vcmask 130048   ;;  %vm134_vm2 = vcmask 261120   ;;  %s848_s1 = inlined_call_operand.vmem [shape: f32[16,32], index: 1, kind: input, shape index: {}]   ;;  %s849_s0 = inlined_call_operand.vmem [shape: f32[8,16], index: 0, kind: input, shape index: {}]   ;;  %s850_s3 = inlined_call_operand.vmem [shape: f32[32,64], index: 3, kind: input, shape index: {}]   ;;  %s851_s2 = inlined_call_operand.vmem [shape: f32[1,32], index: 2, kind: input, shape index: {}]   ;;  %s852_s5 = inlined_call_operand.vmem [shape: f32[64,32], index: 5, kind: input, shape index: {}]   ;;  %s853_s4 = inlined_call_operand.vmem [shape: f32[1,64], index: 4, kind: input, shape index: {}]   ;;  %s854_s7 = inlined_call_operand.vmem [shape: f32[32,128], index: 7, kind: input, shape index: {}]   ;;  %s855_s9 = inlined_call_operand.vmem [shape: f32[128,16], index: 9, kind: input, shape index: {}]   ;;  %s856_s6 = inlined_call_operand.vmem [shape: f32[1,32], index: 6, kind: input, shape index: {}]   ;;  %s857_s8 = inlined_call_operand.vmem [shape: f32[1,128], index: 8, kind: input, shape index: {}]   ;;  %s858_s10 = inlined_call_operand.vmem [shape: f32[1,16], index: 10, kind: input, shape index: {}]   ;;  %s859_s11 = inlined_call_operand.vmem [shape: f32[8,16], index: 11, kind: output, shape index: {}]  }
   0x1   :  { %530 = vmatprep.subr.mxu0 %v615_v0  ;;  %v40_v1 = vld [vmem:[%s848_s1 + $0x8] sm:$0xff]  ;;  %v39_v2 = vld [vmem:[%s848_s1] sm:$0xff]  ;;  %534 = vmatprep.mubr.msk.f32.mxu0 %vm616_vm0, %v615_v0  ;;  %v126_v4 = vld [vmem:[%s850_s3 + $0x18] sm:$0xff]  ;;  %vm224_vm3 = vcmask 523264  }
   0x2   :  { %531 = vmatpush3.msra.mxu0 %v40_v1  ;;  %v38_v3 = vld [vmem:[%s849_s0] sm:$0xff]  ;;  %578 = vmatprep.subr.mxu1 %v615_v0  ;;  %v125_v5 = vld [vmem:[%s850_s3 + $0x10] sm:$0xff]  ;;  %v124_v6 = vld [vmem:[%s850_s3 + $0x8] sm:$0xff] }
   0x3   :  { %532 = vmatprep.subr.mxu0 %v615_v0  ;;  %610 = vmatprep.mubr.msk.f32.mxu1 %vm616_vm0, %v615_v0  ;;  %v123_v7 = vld [vmem:[%s850_s3] sm:$0xff]  ;;  %v216_v13 = vld [vmem:[%s852_s5 + $0x38] sm:$0xff]  ;;  %v215_v14 = vld [vmem:[%s852_s5 + $0x30] sm:$0xff] }
   0x4   :  { %533 = vmatpush3.msra.mxu0 %v39_v2  ;;  %v482_v8 = vld [vmem:[%s851_s2] ss:$0 sm:$0xff]  ;;  %v214_v15 = vld [vmem:[%s852_s5 + $0x28] sm:$0xff]  ;;  %v212_v17 = vld [vmem:[%s852_s5 + $0x18] sm:$0xff] }
   0x5   :  { %535 = vmatmul.mubr.msk.f32.vlgmr.msra.gmra.mxu0 %vm48_vm1, %v38_v3  ;;  %537 = vmatprep.subr.mxu0 %v615_v0  ;;  %v213_v16 = vld [vmem:[%s852_s5 + $0x20] sm:$0xff]  ;;  %v211_v18 = vld [vmem:[%s852_s5 + $0x10] sm:$0xff]  ;;  %v210_v19 = vld [vmem:[%s852_s5 + $0x8] sm:$0xff] }
   0x6   :  { %538 = vmatpush3.msra.mxu0 %v126_v4  ;;  %545 = vmatprep.mubr.msk.f32.mxu0 %vm616_vm0, %v615_v0  ;;  %v209_v20 = vld [vmem:[%s852_s5] sm:$0xff]  ;;  %v302_v26 = vld [vmem:[%s854_s7 + $0x18] sm:$0xff]  ;;  %v301_v27 = vld [vmem:[%s854_s7 + $0x10] sm:$0xff] }
   0x7   :  { %539 = vmatprep.subr.mxu0 %v615_v0  ;;  %v484_v21 = vld [vmem:[%s853_s4] ss:$0 sm:$0xff]  ;;  %v300_v28 = vld [vmem:[%s854_s7 + $0x8] sm:$0xff]  ;;  %v399_v30 = vld [vmem:[%s855_s9 + $0x78] sm:$0xff] }
   0x8   :  { %540 = vmatpush3.msra.mxu0 %v125_v5  ;;  %v299_v29 = vld [vmem:[%s854_s7] sm:$0xff]  ;;  %v398_v31 = vld [vmem:[%s855_s9 + $0x70] sm:$0xff]  ;;  %579 = vmatpush3.msra.mxu1 %v399_v30  ;;  %v397_v32 = vld [vmem:[%s855_s9 + $0x68] sm:$0xff] }
   0x9   :  { %541 = vmatprep.subr.mxu0 %v615_v0  ;;  %580 = vmatprep.subr.mxu1 %v615_v0  ;;  %v396_v33 = vld [vmem:[%s855_s9 + $0x60] sm:$0xff]  ;;  %v395_v34 = vld [vmem:[%s855_s9 + $0x58] sm:$0xff]  ;;  %v394_v35 = vld [vmem:[%s855_s9 + $0x50] sm:$0xff] }
   0xa   :  { %542 = vmatpush3.msra.mxu0 %v124_v6  ;;  %581 = vmatpush3.msra.mxu1 %v398_v31  ;;  %v393_v36 = vld [vmem:[%s855_s9 + $0x48] sm:$0xff]  ;;  %v392_v37 = vld [vmem:[%s855_s9 + $0x40] sm:$0xff]  ;;  %v391_v38 = vld [vmem:[%s855_s9 + $0x38] sm:$0xff] }
   0xb   :  { %543 = vmatprep.subr.mxu0 %v615_v0  ;;  %582 = vmatprep.subr.mxu1 %v615_v0  ;;  %v390_v39 = vld [vmem:[%s855_s9 + $0x30] sm:$0xff]  ;;  %v389_v40 = vld [vmem:[%s855_s9 + $0x28] sm:$0xff]  ;;  %v388_v41 = vld [vmem:[%s855_s9 + $0x20] sm:$0xff] }
   0xc   :  { %544 = vmatpush3.msra.mxu0 %v123_v7  ;;  %583 = vmatpush3.msra.mxu1 %v397_v32  ;;  %v387_v42 = vld [vmem:[%s855_s9 + $0x18] sm:$0xff]  ;;  %v486_v43 = vld [vmem:[%s856_s6] ss:$0 sm:$0xff]  ;;  %v386_v48 = vld [vmem:[%s855_s9 + $0x10] sm:$0xff] }
   0xd   :  { %548 = vmatprep.subr.mxu0 %v615_v0  ;;  %584 = vmatprep.subr.mxu1 %v615_v0  ;;  %v385_v49 = vld [vmem:[%s855_s9 + $0x8] sm:$0xff]  ;;  %v384_v50 = vld [vmem:[%s855_s9] sm:$0xff] }
   0xe   :  { %585 = vmatpush3.msra.mxu1 %v396_v33  ;;  %v488_v51 = vld [vmem:[%s857_s8] ss:$0 sm:$0xff] }
   0xf   :  { %586 = vmatprep.subr.mxu1 %v615_v0  ;;  %v490_v56 = vld [vmem:[%s858_s10] ss:$0 sm:$0xff] }
  0x10   :  { %587 = vmatpush3.msra.mxu1 %v395_v34 }
  0x11   :  { %588 = vmatprep.subr.mxu1 %v615_v0 }
  0x12   :  { %589 = vmatpush3.msra.mxu1 %v394_v35 }
  0x13   :  { %590 = vmatprep.subr.mxu1 %v615_v0 }
  0x14   :  { %591 = vmatpush3.msra.mxu1 %v393_v36 }
  0x15   :  { %592 = vmatprep.subr.mxu1 %v615_v0 }
  0x16   :  { %593 = vmatpush3.msra.mxu1 %v392_v37 }
  0x17   :  { %594 = vmatprep.subr.mxu1 %v615_v0 }
  0x18   :  { %595 = vmatpush3.msra.mxu1 %v391_v38 }
  0x19   :  { %596 = vmatprep.subr.mxu1 %v615_v0 }
  0x1a   :  { %597 = vmatpush3.msra.mxu1 %v390_v39 }
  0x1b   :  { %598 = vmatprep.subr.mxu1 %v615_v0 }
  0x1c   :  { %599 = vmatpush3.msra.mxu1 %v389_v40 }
  0x1d   :  { %600 = vmatprep.subr.mxu1 %v615_v0 }
  0x1e   :  { %601 = vmatpush3.msra.mxu1 %v388_v41 }
  0x1f   :  { %602 = vmatprep.subr.mxu1 %v615_v0 }
  0x20   :  { %603 = vmatpush3.msra.mxu1 %v387_v42 }
  0x21   :  { %604 = vmatprep.subr.mxu1 %v615_v0 }
  0x22   :  { %605 = vmatpush3.msra.mxu1 %v386_v48 }
  0x23   :  { %606 = vmatprep.subr.mxu1 %v615_v0 }
  0x24   :  { %607 = vmatpush3.msra.mxu1 %v385_v49 }
  0x25   :  { %608 = vmatprep.subr.mxu1 %v615_v0 }
  0x26   :  { %609 = vmatpush3.msra.mxu1 %v384_v50 }
  0xc5   :  { %v118_v9 = vpop.f32.mrf.mxu0 }
  0xc6   :  { %v119_v10 = vadd.f32 %v482_v8, %v118_v9 }
  0xc7   :  { %v536_v11 = vpop.f32.mrf.mxu0 }
  0xc8   :  { %v122_v12 = vmax.f32 %v119_v10, 0.0 }
  0xca   :  { %546 = vmatmul.mubr.msk.f32.vlgmr.msra.gmra.mxu0 %vm134_vm2, %v122_v12 }
  0xcb   :  { %549 = vmatpush3.msra.mxu0 %v216_v13  ;;  %564 = vmatprep.mubr.msk.f32.mxu0 %vm616_vm0, %v615_v0 }
  0xcc   :  { %550 = vmatprep.subr.mxu0 %v615_v0 }
  0xcd   :  { %551 = vmatpush3.msra.mxu0 %v215_v14 }
  0xce   :  { %552 = vmatprep.subr.mxu0 %v615_v0 }
  0xcf   :  { %553 = vmatpush3.msra.mxu0 %v214_v15 }
  0xd0   :  { %554 = vmatprep.subr.mxu0 %v615_v0 }
  0xd1   :  { %555 = vmatpush3.msra.mxu0 %v213_v16 }
  0xd2   :  { %556 = vmatprep.subr.mxu0 %v615_v0 }
  0xd3   :  { %557 = vmatpush3.msra.mxu0 %v212_v17 }
  0xd4   :  { %558 = vmatprep.subr.mxu0 %v615_v0 }
  0xd5   :  { %559 = vmatpush3.msra.mxu0 %v211_v18 }
  0xd6   :  { %560 = vmatprep.subr.mxu0 %v615_v0 }
  0xd7   :  { %561 = vmatpush3.msra.mxu0 %v210_v19 }
  0xd8   :  { %562 = vmatprep.subr.mxu0 %v615_v0 }
  0xd9   :  { %563 = vmatpush3.msra.mxu0 %v209_v20 }
  0xda   :  { %567 = vmatprep.subr.mxu0 %v615_v0 }
 0x18a   :  { %v204_v22 = vpop.f32.mrf.mxu0 }
 0x18b   :  { %v205_v23 = vadd.f32 %v484_v21, %v204_v22 }
 0x18c   :  { %v547_v24 = vpop.f32.mrf.mxu0 }
 0x18d   :  { %v208_v25 = vmax.f32 %v205_v23, 0.0 }
 0x18f   :  { %565 = vmatmul.mubr.msk.f32.vlgmr.msra.gmra.mxu0 %vm224_vm3, %v208_v25 }
 0x190   :  { %568 = vmatpush3.msra.mxu0 %v302_v26  ;;  %575 = vmatprep.mubr.msk.f32.mxu0 %vm616_vm0, %v615_v0 }
 0x191   :  { %569 = vmatprep.subr.mxu0 %v615_v0 }
 0x192   :  { %570 = vmatpush3.msra.mxu0 %v301_v27 }
 0x193   :  { %571 = vmatprep.subr.mxu0 %v615_v0 }
 0x194   :  { %572 = vmatpush3.msra.mxu0 %v300_v28 }
 0x195   :  { %573 = vmatprep.subr.mxu0 %v615_v0 }
 0x196   :  { %574 = vmatpush3.msra.mxu0 %v299_v29 }
 0x24f   :  { %v294_v44 = vpop.f32.mrf.mxu0 }
 0x250   :  { %v295_v45 = vadd.f32 %v486_v43, %v294_v44 }
 0x251   :  { %v566_v46 = vpop.f32.mrf.mxu0 }
 0x252   :  { %v298_v47 = vmax.f32 %v295_v45, 0.0 }
 0x254   :  { %576 = vmatmul.mubr.msk.f32.vlgmr.msra.gmra.mxu0 %vm134_vm2, %v298_v47 }
 0x314   :  { %v379_v52 = vpop.f32.mrf.mxu0 }
 0x315   :  { %v380_v53 = vadd.f32 %v488_v51, %v379_v52 }
 0x316   :  { %v577_v54 = vpop.f32.mrf.mxu0 }
 0x317   :  { %v383_v55 = vmax.f32 %v380_v53, 0.0 }
 0x319   :  { %611 = vmatmul.mubr.f32.vlgmr.msra.gmra.mxu1 %v383_v55 }
 0x3d9   :  { %v473_v57 = vpop.f32.mrf.mxu1 }
 0x3da   :  { %v474_v58 = vadd.f32 %v490_v56, %v473_v57 }
 0x3db   :  { %v612_v59 = vpop.f32.mrf.mxu1 }
 0x3dc   :  { %477 = vst.msk [vmem:[%s859_s11] sm:$0xff] %vm48_vm1, %v474_v58 }

</bundles_post_ra>
